<compile_context>
chip_gen: v6e
topology: v6e:2x2x1
jax: 0.10.0
libtpu: 0.0.40
codegen_flags: <defaults>
</compile_context>

<pallas_src>
import jax
import jax.numpy as jnp
from jax.experimental import pallas as pl
from jax.experimental.pallas import tpu as pltpu


def mlp_kernel(xT_ref, w1T_ref, b1_ref, w2T_ref, b2_ref, oT_ref):
    xT = xT_ref[...]        # (K, TILE_B)  f32, batch on lanes
    w1T = w1T_ref[...]      # (H, K)       resident
    w2T = w2T_ref[...]      # (O, H)       resident

    # Layer 1 (MXU): (H, K) @ (K, TILE_B) -> (H, TILE_B), bias column-broadcast.
    h = jnp.dot(w1T, xT, preferred_element_type=jnp.float32) + b1_ref[...]
    h = jnp.maximum(h, 0.0)  # ReLU (VPU)

    # Layer 2 (MXU): (O, H) @ (H, TILE_B) -> (O, TILE_B), lane-dense store.
    yT = jnp.dot(w2T, h, preferred_element_type=jnp.float32) + b2_ref[...]
    oT_ref[...] = yT.astype(oT_ref.dtype)


def prepare_params(w1, b1, w2, b2):
    """One-time layout prep; reuse the result across every forward call."""
    w1T = jnp.asarray(w1, jnp.float32).T                 # (hidden, input_size)
    b1c = jnp.asarray(b1, jnp.float32).reshape(-1, 1)    # (hidden, 1)
    w2T = jnp.asarray(w2, jnp.float32).T                 # (output_size, hidden)
    b2c = jnp.asarray(b2, jnp.float32).reshape(-1, 1)    # (output_size, 1)
    return w1T, b1c, w2T, b2c


def mlp_forward(x, prepared_params, *, tile_b=None, max_tile_b=2048):
    """Forward pass. x: (batch, input_size) -> (batch, output_size)."""
    w1T, b1c, w2T, b2c = prepared_params
    batch, in_size = x.shape
    hidden = w1T.shape[0]
    out_size = w2T.shape[0]

    # Lane tile: large (amortize per-grid-step overhead), multiple of 128,
    # no bigger than the 128-rounded batch (avoid useless padded work).
    b128 = pl.cdiv(batch, 128) * 128
    if tile_b is None:
        tile_b = min(max_tile_b, b128)
    tile_b = max(128, (tile_b // 128) * 128)
    padded_b = pl.cdiv(batch, tile_b) * tile_b

    # Feature-major input: batch on the lane axis.
    xT = jnp.transpose(jnp.asarray(x, jnp.float32))       # (in_size, batch)
    if padded_b != batch:
        xT = jnp.pad(xT, ((0, 0), (0, padded_b - batch)))

    grid = (padded_b // tile_b,)

    yT = pl.pallas_call(
        mlp_kernel,
        out_shape=jax.ShapeDtypeStruct((out_size, padded_b), jnp.float32),
        grid_spec=pltpu.PrefetchScalarGridSpec(
            num_scalar_prefetch=0,
            grid=grid,
            in_specs=[
                # x streams through the pipeline, batch tiled along lanes.
                pl.BlockSpec((in_size, tile_b), lambda i: (0, i)),
                # Weights/biases: constant index_map -> VMEM-resident for all steps.
                pl.BlockSpec((hidden, in_size), lambda i: (0, 0)),
                pl.BlockSpec((hidden, 1), lambda i: (0, 0)),
                pl.BlockSpec((out_size, hidden), lambda i: (0, 0)),
                pl.BlockSpec((out_size, 1), lambda i: (0, 0)),
            ],
            out_specs=pl.BlockSpec((out_size, tile_b), lambda i: (0, i)),
        ),
        compiler_params=pltpu.CompilerParams(
            dimension_semantics=("parallel",),
        ),
    )(xT, w1T, b1c, w2T, b2c)

    # Tiny (out_size, batch) result -> PyTorch's (batch, out_size).
    return yT[:, :batch].T


def init_params(key, input_size, hidden, output_size):
    # Deterministic init mimicking PyTorch nn.Linear default (U(-1/sqrt(fan_in), +)).
    k1, k2, k3, k4 = jax.random.split(key, 4)
    lim1 = 1.0 / jnp.sqrt(jnp.float32(input_size))
    lim2 = 1.0 / jnp.sqrt(jnp.float32(hidden))
    w1 = jax.random.uniform(k1, (input_size, hidden), jnp.float32, -lim1, lim1)
    b1 = jax.random.uniform(k2, (hidden,), jnp.float32, -lim1, lim1)
    w2 = jax.random.uniform(k3, (hidden, output_size), jnp.float32, -lim2, lim2)
    b2 = jax.random.uniform(k4, (output_size,), jnp.float32, -lim2, lim2)
    return w1, b1, w2, b2


if __name__ == "__main__":
    key = jax.random.PRNGKey(0)
    # CartPole-style feature sizes; modest batch (CEM population / rollout states).
    batch, input_size, hidden, output_size = 256, 4, 64, 2

    kx, kp = jax.random.split(key)
    x = jax.random.normal(kx, (batch, input_size), jnp.float32)
    w1, b1, w2, b2 = init_params(kp, input_size, hidden, output_size)

    params = prepare_params(w1, b1, w2, b2)   # one-time layout prep

    # Default path: single large lane tile.
    y = mlp_forward(x, params)
    jax.block_until_ready(y)

    # Reference in plain JAX.
    y_ref = jnp.maximum(x @ w1 + b1, 0.0) @ w2 + b2
    assert y.shape == (batch, output_size)
    assert jnp.allclose(y, y_ref, atol=1e-4), "mismatch vs reference"

    # Exercise the multi-step streaming grid (grid=(2,)).
    y_tiled = mlp_forward(x, params, tile_b=128)
    jax.block_until_ready(y_tiled)
    assert jnp.allclose(y_tiled, y_ref, atol=1e-4), "mismatch (tiled grid)"

    # Non-lane-multiple batch (padding path).
    y_small = mlp_forward(x[:37], params)
    jax.block_until_ready(y_small)
    assert jnp.allclose(y_small, y_ref[:37], atol=1e-4), "mismatch (padded batch)"

    print("KERNEL_OK")
</pallas_src>

<mosaic_0001>
module attributes {stable_mosaic.version = 11 : i64} {
  func.func @mlp_kernel(%arg0: i32, %arg1: memref<4x256xf32, #tpu.memory_space<vmem>>, %arg2: memref<64x4xf32, #tpu.memory_space<vmem>>, %arg3: memref<64x1xf32, #tpu.memory_space<vmem>>, %arg4: memref<2x64xf32, #tpu.memory_space<vmem>>, %arg5: memref<2x1xf32, #tpu.memory_space<vmem>>, %arg6: memref<2x256xf32, #tpu.memory_space<vmem>>) attributes {dimension_semantics = [#tpu.dimension_semantics<parallel>], iteration_bounds = array<i64: 1>, scalar_prefetch = 0 : i64, scratch_operands = 0 : i64, tpu.core_type = #tpu.core_type<tc>, window_params = [{transform_indices = @transform_0, window_bounds = array<i64: 4, 256>}, {pipeline_mode = #tpu.pipeline_mode<synchronous>, transform_indices = @transform_1, window_bounds = array<i64: 64, 4>}, {pipeline_mode = #tpu.pipeline_mode<synchronous>, transform_indices = @transform_2, window_bounds = array<i64: 64, 1>}, {pipeline_mode = #tpu.pipeline_mode<synchronous>, transform_indices = @transform_3, window_bounds = array<i64: 2, 64>}, {pipeline_mode = #tpu.pipeline_mode<synchronous>, transform_indices = @transform_4, window_bounds = array<i64: 2, 1>}, {transform_indices = @transform_5, window_bounds = array<i64: 2, 256>}]} {
    %c0 = arith.constant 0 : index
    %c0_0 = arith.constant 0 : index
    %0 = vector.load %arg1[%c0, %c0_0] : memref<4x256xf32, #tpu.memory_space<vmem>>, vector<4x256xf32>
    %c0_1 = arith.constant 0 : index
    %c0_2 = arith.constant 0 : index
    %1 = vector.load %arg2[%c0_1, %c0_2] : memref<64x4xf32, #tpu.memory_space<vmem>>, vector<64x4xf32>
    %c0_3 = arith.constant 0 : index
    %c0_4 = arith.constant 0 : index
    %2 = vector.load %arg4[%c0_3, %c0_4] : memref<2x64xf32, #tpu.memory_space<vmem>>, vector<2x64xf32>
    %cst = arith.constant dense<0.000000e+00> : vector<64x256xf32>
    %3 = tpu.matmul %1, %0, %cst {dimension_numbers = #tpu.dot_dimension_numbers<[1], [0], [0], [1], [0, 0, 1, 1], [], []>} : vector<64x4xf32>, vector<4x256xf32>, vector<64x256xf32> -> vector<64x256xf32>
    %c0_5 = arith.constant 0 : index
    %c0_6 = arith.constant 0 : index
    %4 = vector.load %arg3[%c0_5, %c0_6] : memref<64x1xf32, #tpu.memory_space<vmem>>, vector<64x1xf32>
    %5 = vector.broadcast %4 : vector<64x1xf32> to vector<64x256xf32>
    %6 = arith.addf %3, %5 : vector<64x256xf32>
    %cst_7 = arith.constant 0.000000e+00 : f32
    %7 = vector.broadcast %cst_7 : f32 to vector<64x256xf32>
    %8 = arith.maximumf %6, %7 : vector<64x256xf32>
    %cst_8 = arith.constant dense<0.000000e+00> : vector<2x256xf32>
    %9 = tpu.matmul %2, %8, %cst_8 {dimension_numbers = #tpu.dot_dimension_numbers<[1], [0], [0], [1], [0, 0, 1, 1], [], []>} : vector<2x64xf32>, vector<64x256xf32>, vector<2x256xf32> -> vector<2x256xf32>
    %c0_9 = arith.constant 0 : index
    %c0_10 = arith.constant 0 : index
    %10 = vector.load %arg5[%c0_9, %c0_10] : memref<2x1xf32, #tpu.memory_space<vmem>>, vector<2x1xf32>
    %11 = vector.broadcast %10 : vector<2x1xf32> to vector<2x256xf32>
    %12 = arith.addf %9, %11 : vector<2x256xf32>
    %c0_11 = arith.constant 0 : index
    %c0_12 = arith.constant 0 : index
    %13 = vector.load %arg6[%c0_11, %c0_12] : memref<2x256xf32, #tpu.memory_space<vmem>>, vector<2x256xf32>
    tpu.vector_store %arg6[%c0_11, %c0_12], %12 {strides = array<i32>} : memref<2x256xf32, #tpu.memory_space<vmem>>, vector<2x256xf32>,
    return
  }
  func.func @transform_0(%arg0: i32) -> (i32, i32) {
    %c0_i32 = arith.constant 0 : i32
    %c0_i32_0 = arith.constant 0 : i32
    return %c0_i32, %arg0 : i32, i32
  }
  func.func @transform_1(%arg0: i32) -> (i32, i32) {
    %c0_i32 = arith.constant 0 : i32
    %c0_i32_0 = arith.constant 0 : i32
    %c0_i32_1 = arith.constant 0 : i32
    return %c0_i32, %c0_i32_0 : i32, i32
  }
  func.func @transform_2(%arg0: i32) -> (i32, i32) {
    %c0_i32 = arith.constant 0 : i32
    %c0_i32_0 = arith.constant 0 : i32
    %c0_i32_1 = arith.constant 0 : i32
    return %c0_i32, %c0_i32_0 : i32, i32
  }
  func.func @transform_3(%arg0: i32) -> (i32, i32) {
    %c0_i32 = arith.constant 0 : i32
    %c0_i32_0 = arith.constant 0 : i32
    %c0_i32_1 = arith.constant 0 : i32
    return %c0_i32, %c0_i32_0 : i32, i32
  }
  func.func @transform_4(%arg0: i32) -> (i32, i32) {
    %c0_i32 = arith.constant 0 : i32
    %c0_i32_0 = arith.constant 0 : i32
    %c0_i32_1 = arith.constant 0 : i32
    return %c0_i32, %c0_i32_0 : i32, i32
  }
  func.func @transform_5(%arg0: i32) -> (i32, i32) {
    %c0_i32 = arith.constant 0 : i32
    %c0_i32_0 = arith.constant 0 : i32
    return %c0_i32, %arg0 : i32, i32
  }
}

</mosaic_0001>

<bundles_post_ra>
// kernel: tpu_custom_call.1
= control target key start
LH: loop header
LB: loop body
LE: loop exit
PB: predicated region body
PF: predicated region fallthrough
CT: control target
= control target key end

     0   :  { %vm106_vm0 = vcmask 1043456   ;;  %v387_v2 = vmov 0.0   ;;  %vm81_vm1 = vcmask 31744   ;;  %v388_v4 = vmov 0   ;;  %s488_s0 = inlined_call_operand.vmem [shape: f32[4,256], index: 0, kind: input, shape index: {}]   ;;  %s489_s1 = inlined_call_operand.vmem [shape: f32[64,4], index: 1, kind: input, shape index: {}]   ;;  %s490_s2 = inlined_call_operand.vmem [shape: f32[64,1], index: 2, kind: input, shape index: {}]   ;;  %s491_s3 = inlined_call_operand.vmem [shape: f32[2,64], index: 3, kind: input, shape index: {}]   ;;  %s492_s4 = inlined_call_operand.vmem [shape: f32[2,1], index: 4, kind: input, shape index: {}]   ;;  %s493_s5 = inlined_call_operand.hbm [shape: f32[2,256], index: 5, kind: output, shape index: {}]  }
   0x1   :  { %v21_v0 = vld [vmem:[%s488_s0] sm:$0xff]  ;;  %175 = vmatprep.mubr.f32.mxu0 %v387_v2  ;;  %314 = vmatprep.mubr.f32.mxu1 %v387_v2  ;;  %v36_v5 = vld [vmem:[%s490_s2 + $0x28] sm:$0xff]  ;;  %v38_v6 = vld [vmem:[%s490_s2 + $0x38] sm:$0xff] }
   0x2   :  { %v80_v1 = vcombine.high %v21_v0, %v21_v0  ;;  %v22_v3 = vld [vmem:[%s489_s1] sm:$0xff]  ;;  %363 = vset.pattern.permute.xlu1 %v388_v4  ;;  %362 = vset.pattern.permute.xlu0 %v388_v4  ;;  %v23_v8 = vld [vmem:[%s489_s1 + $0x8] sm:$0xff]  ;;  %v37_v9 = vld [vmem:[%s490_s2 + $0x30] sm:$0xff] }
   0x3   :  { %66 = vperm.xlu1 %363, %v36_v5   ;;  %76 = vperm.xlu0 %362, %v38_v6   ;;  %v35_v7 = vld [vmem:[%s490_s2 + $0x20] sm:$0xff] }
   0x4   :  { %347 = vmatprep.subr.msk.mxu0 %vm106_vm0, %v80_v1 }
   0x5   :  { %348 = vmatpush1.msk.msra.mxu0 %vm106_vm0, %v21_v0 }
   0x6   :  { %349 = vmatmul.mubr.msk.f32.vlgmr.msra.gmra.mxu0 %vm81_vm1, %v22_v3 }
   0x7   :  { %181 = vmatprep.mubr.f32.mxu0 %v387_v2 }
   0x8   :  { %10 = vsyncpa [#allocation3], 0  ;;  %61 = vperm.xlu1 %363, %v35_v7   ;;  %71 = vperm.xlu0 %362, %v37_v9   ;;  %v33_v10 = vld [vmem:[%s490_s2 + $0x10] sm:$0xff]  ;;  %v34_v12 = vld [vmem:[%s490_s2 + $0x18] sm:$0xff]  ;;  %vm246_vm2 = vcmask 523264   ;;  %s389_s26 = smov [#allocation2]  }
   0x9   :  { %v24_v11 = vld [vmem:[%s489_s1 + $0x10] sm:$0xff]  ;;  %v31_v13 = vld [vmem:[%s490_s2] sm:$0xff]  ;;  %v25_v14 = vld [vmem:[%s489_s1 + $0x18] sm:$0xff]  ;;  %s339_s27 = sshll.u32 %s389_s26, 4  ;;  %s340_s27 = int_to_ptr.vmem [resolvable:$true] %s339_s27 }
   0xa   :  { %350 = vmatmul.mubr.msk.f32.gmra.mxu0 %vm81_vm1, %v23_v8  ;;  %v32_v15 = vld [vmem:[%s490_s2 + $0x8] sm:$0xff]  ;;  %v26_v16 = vld [vmem:[%s489_s1 + $0x20] sm:$0xff]  ;;  %v28_v19 = vld [vmem:[%s489_s1 + $0x30] sm:$0xff]  ;;  %s365_s28 = scalar_lea.vmem %s340_s27, 64  ;;  %p370_p1 = scmp.lt.s32.totalorder %s340_s27, %s340_s27 }
   0xb   :  { %187 = vmatprep.mubr.f32.mxu0 %v387_v2  ;;  %v240_v17 = vld [vmem:[%s492_s4] sm:$0x3]  ;;  %v27_v18 = vld [vmem:[%s489_s1 + $0x28] sm:$0xff]  ;;  %v29_v20 = vld [vmem:[%s489_s1 + $0x38] sm:$0xff]  ;;  %p366_p0 = scmp.ne.s32.totalorder %s340_s27, %s365_s28  ;;  %p371_p2 = scmp.lt.s32.totalorder %s365_s28, %s365_s28 }
   0xc   :  { %51 = vperm.xlu1 %363, %v33_v10   ;;  %56 = vperm.xlu0 %362, %v34_v12  }
   0xd   :  { %p372_p3 = por %p371_p2, %p370_p1 }
   0xe   :  { %351 = vmatmul.mubr.msk.f32.gmra.mxu0 %vm81_vm1, %v24_v11 }
   0xf   :  { %193 = vmatprep.mubr.f32.mxu0 %v387_v2  ;;  %p373_p4 = pnand %p372_p3, %p366_p0 }
  0x10   :  { %41 = vperm.xlu1 %363, %v31_v13   ;;  %46 = vperm.xlu0 %362, %v32_v15   ;;  %v30_v13 = vld [vmem:[%s491_s3] sm:$0x3] }
  0x12   :  { %352 = vmatmul.mubr.msk.f32.gmra.mxu0 %vm81_vm1, %v25_v14 }
  0x13   :  { %199 = vmatprep.mubr.f32.mxu0 %v387_v2 }
  0x14   :  { %243 = vperm.xlu0 %362, %v240_v17  }
  0x16   :  { %353 = vmatmul.mubr.msk.f32.gmra.mxu0 %vm81_vm1, %v26_v16 }
  0x17   :  { %205 = vmatprep.mubr.f32.mxu0 %v387_v2 }
  0x1a   :  { %354 = vmatmul.mubr.msk.f32.gmra.mxu0 %vm81_vm1, %v27_v18 }
  0x1b   :  { %211 = vmatprep.mubr.f32.mxu0 %v387_v2 }
  0x1e   :  { %355 = vmatmul.mubr.msk.f32.gmra.mxu0 %vm81_vm1, %v28_v19 }
  0x1f   :  { %217 = vmatprep.mubr.f32.mxu0 %v387_v2 }
  0x22   :  { %356 = vmatmul.mubr.msk.f32.gmra.mxu0 %vm81_vm1, %v29_v20 }
  0x7e   :  { %v77_v32 = vpop.permute.xlu0 %76  ;;  %v67_v34 = vpop.permute.xlu1 %66 }
  0x83   :  { %v72_v37 = vpop.permute.xlu0 %71  ;;  %v62_v39 = vpop.permute.xlu1 %61 }
  0x87   :  { %v57_v45 = vpop.permute.xlu0 %56  ;;  %v52_v50 = vpop.permute.xlu1 %51 }
  0x8b   :  { %v47_v59 = vpop.permute.xlu0 %46  ;;  %v42_v0 = vpop.permute.xlu1 %41 }
  0x8f   :  { %v244_v15 = vpop.permute.xlu0 %243 }
  0xc6   :  { %v177_v21 = vpop.f32.mrf.mxu0 }
  0xc7   :  { %v178_v7 = vadd.f32 %v177_v21, %v42_v0 }
  0xc8   :  { %v179_v22 = vpop.f32.mrf.mxu0 }
  0xc9   :  { %v180_v5 = vadd.f32 %v179_v22, %v42_v0  ;;  %v224_v12 = vmax.f32 %v178_v7, 0.0 }
  0xca   :  { %v183_v23 = vpop.f32.mrf.mxu0 }
  0xcb   :  { %v184_v3 = vadd.f32 %v183_v23, %v47_v59  ;;  %v225_v11 = vmax.f32 %v180_v5, 0.0 }
  0xcc   :  { %v185_v24 = vpop.f32.mrf.mxu0 }
  0xcd   :  { %v186_v1 = vadd.f32 %v185_v24, %v47_v59  ;;  %v226_v10 = vmax.f32 %v184_v3, 0.0 }
  0xce   :  { %v189_v25 = vpop.f32.mrf.mxu0 }
  0xcf   :  { %v190_v62 = vadd.f32 %v189_v25, %v52_v50  ;;  %v227_v9 = vmax.f32 %v186_v1, 0.0 }
  0xd0   :  { %v191_v26 = vpop.f32.mrf.mxu0 }
  0xd1   :  { %v192_v60 = vadd.f32 %v191_v26, %v52_v50  ;;  %v228_v8 = vmax.f32 %v190_v62, 0.0 }
  0xd2   :  { %v195_v27 = vpop.f32.mrf.mxu0 }
  0xd3   :  { %v196_v57 = vadd.f32 %v195_v27, %v57_v45  ;;  %v229_v6 = vmax.f32 %v192_v60, 0.0 }
  0xd4   :  { %v197_v28 = vpop.f32.mrf.mxu0 }
  0xd5   :  { %v198_v55 = vadd.f32 %v197_v28, %v57_v45  ;;  %v230_v4 = vmax.f32 %v196_v57, 0.0 }
  0xd6   :  { %v201_v29 = vpop.f32.mrf.mxu0 }
  0xd7   :  { %v202_v53 = vadd.f32 %v201_v29, %v62_v39  ;;  %v231_v2 = vmax.f32 %v198_v55, 0.0 }
  0xd8   :  { %v203_v30 = vpop.f32.mrf.mxu0 }
  0xd9   :  { %v204_v51 = vadd.f32 %v203_v30, %v62_v39  ;;  %v232_v63 = vmax.f32 %v202_v53, 0.0 }
  0xda   :  { %v207_v31 = vpop.f32.mrf.mxu0 }
  0xdb   :  { %v208_v48 = vadd.f32 %v207_v31, %v67_v34  ;;  %v233_v61 = vmax.f32 %v204_v51, 0.0 }
  0xdc   :  { %v209_v33 = vpop.f32.mrf.mxu0 }
  0xdd   :  { %v210_v46 = vadd.f32 %v209_v33, %v67_v34  ;;  %v234_v58 = vmax.f32 %v208_v48, 0.0 }
  0xde   :  { %v213_v35 = vpop.f32.mrf.mxu0 }
  0xdf   :  { %v214_v44 = vadd.f32 %v213_v35, %v72_v37  ;;  %v235_v56 = vmax.f32 %v210_v46, 0.0 }
  0xe0   :  { %v215_v36 = vpop.f32.mrf.mxu0 }
  0xe1   :  { %v216_v42 = vadd.f32 %v215_v36, %v72_v37  ;;  %v236_v54 = vmax.f32 %v214_v44, 0.0 }
  0xe2   :  { %v219_v38 = vpop.f32.mrf.mxu0 }
  0xe3   :  { %v220_v40 = vadd.f32 %v219_v38, %v77_v32  ;;  %v237_v52 = vmax.f32 %v216_v42, 0.0 }
  0xe4   :  { %v221_v41 = vpop.f32.mrf.mxu0 }
  0xe5   :  { %v222_v43 = vadd.f32 %v221_v41, %v77_v32  ;;  %v238_v49 = vmax.f32 %v220_v40, 0.0 }
  0xe7   :  { %v239_v47 = vmax.f32 %v222_v43, 0.0 }
  0xe9   :  { %266 = vmatprep.subr.mxu1 %v239_v47 }
  0xea   :  { %267 = vmatpush1.msra.mxu1 %v238_v49 }
  0xeb   :  { %268 = vmatprep.subr.mxu1 %v237_v52 }
  0xec   :  { %269 = vmatpush1.msra.mxu1 %v236_v54 }
  0xed   :  { %270 = vmatprep.subr.mxu1 %v235_v56 }
  0xee   :  { %271 = vmatpush1.msra.mxu1 %v234_v58 }
  0xef   :  { %272 = vmatprep.subr.mxu1 %v233_v61 }
  0xf0   :  { %273 = vmatpush1.msra.mxu1 %v232_v63 }
  0xf1   :  { %274 = vmatprep.subr.mxu1 %v231_v2 }
  0xf2   :  { %275 = vmatpush1.msra.mxu1 %v230_v4 }
  0xf3   :  { %276 = vmatprep.subr.mxu1 %v229_v6 }
  0xf4   :  { %277 = vmatpush1.msra.mxu1 %v228_v8 }
  0xf5   :  { %278 = vmatprep.subr.mxu1 %v227_v9 }
  0xf6   :  { %279 = vmatpush1.msra.mxu1 %v226_v10 }
  0xf7   :  { %280 = vmatprep.subr.mxu1 %v225_v11 }
  0xf8   :  { %281 = vmatpush1.msra.mxu1 %v224_v12 }
  0xf9   :  { %357 = vmatmul.mubr.msk.f32.vlgmr.msra.gmra.mxu1 %vm246_vm2, %v30_v13 }
 0x1b9   :  { %v316_v14 = vpop.f32.mrf.mxu1 }
 0x1ba   :  { %v317_v17 = vadd.f32 %v316_v14, %v244_v15 }
 0x1bb   :  { %v318_v16 = vpop.f32.mrf.mxu1 }
 0x1bc   :  { %v319_v18 = vadd.f32 %v318_v16, %v244_v15 }
 0x1be   :  { %v323_v19 = vcombine.low %v317_v17, %v319_v18 }
 0x1c0   :  { %358 = vst.sshfl [vmem:[#allocation2] sm:$0x33 pattern:$0x76325410] %v323_v19 }
 0x1c1   :  { %376 = shalt.err (!%p373_p4)
}
 0x1c2   :  { %342 = dma.vmem_to_hbm [thread:$0]  %s340_s27, 64, %s493_s5, [#allocation3]  }
 0x1c3   :  { %385 = dma.done.wait [#allocation3], 64  }
 0x1c4   :  { %386 = vsyncadd [#allocation3], 4294967232 }
 0x1c5   :  { %346 = vsyncpa [#allocation3], 1 }

</bundles_post_ra>
